<compile_context>
chip_gen: v6e
topology: v6e:2x2x1
jax: 0.10.0
libtpu: 0.0.40
codegen_flags: <defaults>
</compile_context>

<pallas_src>
import functools
import math

import jax
import jax.numpy as jnp
import numpy as np
from jax.experimental import pallas as pl
from jax.experimental.pallas import tpu as pltpu

LN_EPS = 1e-5      # PyTorch nn.LayerNorm default
NEG_INF = -1e30    # large finite negative (safer than -inf)


# ------------------------------ shared math --------------------------------

def _layer_norm(x, gamma, beta):
    mu = jnp.mean(x, axis=-1, keepdims=True)
    var = jnp.mean(jnp.square(x - mu), axis=-1, keepdims=True)
    return (x - mu) * jax.lax.rsqrt(var + LN_EPS) * gamma + beta


def _mm(a, b):
    """a @ b with bf16 MXU operands, f32 accumulation (astype is a no-op if already bf16)."""
    return jax.lax.dot_general(
        a.astype(jnp.bfloat16), b.astype(jnp.bfloat16),
        (((1,), (0,)), ((), ())), preferred_element_type=jnp.float32)


def _mm_nt(a, b):
    """a @ b.T without materializing the transpose (bf16 operands, f32 acc)."""
    return jax.lax.dot_general(
        a.astype(jnp.bfloat16), b.astype(jnp.bfloat16),
        (((1,), (1,)), ((), ())), preferred_element_type=jnp.float32)


# ----------------------------- fused Pallas kernel --------------------------

def _fused_net_kernel(heads, hidden,
                      x_ref, wemb_ref, bemb_ref, pe_ref,
                      wqkv_ref, wu_ref, bu_ref, g1_ref, b1_ref,
                      wf1_ref, bf1_ref, wf2_ref, bf2_ref, g2_ref, b2_ref,
                      o_ref, att_ref):
    H = hidden
    HH = heads * H
    T = o_ref.shape[0]
    layer = pl.program_id(1)

    # Layer 0: embed + positional encoding; o_ref is the VMEM-resident activation
    # carry across the layer grid axis (written every layer, flushed once per batch).
    @pl.when(layer == 0)
    def _embed():
        o_ref[...] = (_mm(x_ref[...], wemb_ref[...])
                      + bemb_ref[...] + pe_ref[...])

    x = o_ref[...]                                     # (T, H) f32

    # Causal additive mask generated in-kernel (no HBM traffic; VPU filler).
    row = jax.lax.broadcasted_iota(jnp.int32, (T, T), 0)
    col = jax.lax.broadcasted_iota(jnp.int32, (T, T), 1)
    mask = jnp.where(col <= row, jnp.float32(0.0), jnp.float32(NEG_INF))

    # Fused QKV projection; 1/sqrt(H) is pre-folded into the Wq columns at init,
    # so qkv slices are MXU-ready after a single bf16 cast.
    qkv = _mm(x, wqkv_ref[...]).astype(jnp.bfloat16)   # (T, 3*HH) bf16

    for h in range(heads):                             # heads is a small static int
        q = qkv[:, 0 * HH + h * H: 0 * HH + (h + 1) * H]
        k = qkv[:, 1 * HH + h * H: 1 * HH + (h + 1) * H]
        v = qkv[:, 2 * HH + h * H: 2 * HH + (h + 1) * H]
        s = _mm_nt(q, k) + mask                        # (T, T) f32 scores
        m = jnp.max(s, axis=-1, keepdims=True)
        p = jnp.exp(s - m)                             # f32 exp (v5e EUP has no bf16)
        p = p * pl.reciprocal(jnp.sum(p, axis=-1, keepdims=True), approx=True)
        # static-slice store of the per-head attended output (MXU-ready bf16)
        att_ref[:, h * H:(h + 1) * H] = _mm(p, v).astype(jnp.bfloat16)

    # Single K=HH unify matmul instead of `heads` tiny K=H matmuls.
    attended = _mm(att_ref[...], wu_ref[...]) + bu_ref[...]
    x1 = _layer_norm(attended + x, g1_ref[...], b1_ref[...])

    ff = jnp.maximum(_mm(x1, wf1_ref[...]) + bf1_ref[...], 0.0)
    y = _mm(ff, wf2_ref[...]) + bf2_ref[...]
    x2 = _layer_norm(y + x1, g2_ref[...], b2_ref[...])

    o_ref[...] = x2                                    # carry to next layer step


@functools.partial(jax.jit, static_argnames=("heads",))
def transformer_net(x, params, heads):
    B, T, E = x.shape
    H = params["w_emb"].shape[1]
    HH = heads * H
    FF = params["wf1"].shape[2]
    L = params["wqkv"].shape[0]

    const = lambda shape: pl.BlockSpec(shape, lambda b, l, _n=len(shape): (0,) * _n)
    perlayer = lambda shape: pl.BlockSpec(
        (None,) + shape, lambda b, l, _n=len(shape): (l,) + (0,) * _n)
    perbatch = lambda shape: pl.BlockSpec(
        (None,) + shape, lambda b, l, _n=len(shape): (b,) + (0,) * _n)

    out = pl.pallas_call(
        functools.partial(_fused_net_kernel, heads, H),
        out_shape=jax.ShapeDtypeStruct((B, T, H), jnp.float32),
        grid=(B, L),
        in_specs=[
            perbatch((T, E)),                 # x (fetched once per batch)
            const((E, H)),                    # w_emb (bf16)
            const((1, H)),                    # b_emb
            const((T, H)),                    # positional encoding
            perlayer((H, 3 * HH)),            # fused Wqkv (bf16, q pre-scaled)
            perlayer((HH, H)), perlayer((1, H)),      # Wu (bf16), bu
            perlayer((1, H)), perlayer((1, H)),       # LN1 gamma, beta
            perlayer((H, FF)), perlayer((1, FF)),     # FF1 (bf16), bias
            perlayer((FF, H)), perlayer((1, H)),      # FF2 (bf16), bias
            perlayer((1, H)), perlayer((1, H)),       # LN2 gamma, beta
        ],
        out_specs=perbatch((T, H)),           # resident across layer axis, 1 writeback/batch
        scratch_shapes=[pltpu.VMEM((T, HH), jnp.bfloat16)],   # per-head attended slab
        compiler_params=pltpu.CompilerParams(
            dimension_semantics=("parallel", "arbitrary"),
            vmem_limit_bytes=32 * 1024 * 1024),
    )(x, params["w_emb"], params["b_emb"], params["pe"],
      params["wqkv"], params["wu"], params["bu"],
      params["g1"], params["b1"],
      params["wf1"], params["bf1"], params["wf2"], params["bf2"],
      params["g2"], params["b2"])

    return out


# ------------------------- pure-JAX reference (check) ----------------------
# Natural per-batch/per-head formulation with the same bf16 matmul operands and
# f32 accumulation, consuming the same (pre-scaled, bf16) weights.

def _ref_net(x, params, heads):
    B, T, E = x.shape
    H = params["w_emb"].shape[1]
    HH = heads * H
    L = params["wqkv"].shape[0]

    def mm(a, b):
        return jnp.dot(a.astype(jnp.bfloat16), b.astype(jnp.bfloat16),
                       preferred_element_type=jnp.float32)

    h2d = mm(x.reshape(B * T, E), params["w_emb"]) + params["b_emb"]
    h2d = (h2d.reshape(B, T, H) + params["pe"][None]).reshape(B * T, H)

    causal = np.tril(np.ones((T, T), dtype=bool))
    for l in range(L):
        qkv = mm(h2d, params["wqkv"][l])               # (B*T, 3*HH); q already scaled
        q, k, v = jnp.split(qkv, 3, axis=1)

        def to_bhtd(z):
            return z.reshape(B, T, heads, H).transpose(0, 2, 1, 3)
        qh, kh, vh = to_bhtd(q), to_bhtd(k), to_bhtd(v)
        s = jnp.einsum("bhqd,bhkd->bhqk",
                       qh.astype(jnp.bfloat16), kh.astype(jnp.bfloat16),
                       preferred_element_type=jnp.float32)
        s = jnp.where(causal[None, None], s, NEG_INF)
        p = jax.nn.softmax(s, axis=-1)
        o = jnp.einsum("bhqk,bhkd->bhqd",
                       p.astype(jnp.bfloat16), vh.astype(jnp.bfloat16),
                       preferred_element_type=jnp.float32)
        att = o.transpose(0, 2, 1, 3).reshape(B * T, HH)

        attended = mm(att, params["wu"][l]) + params["bu"][l]
        x1 = _layer_norm(attended + h2d, params["g1"][l], params["b1"][l])
        ffh = jax.nn.relu(mm(x1, params["wf1"][l]) + params["bf1"][l])
        y = mm(ffh, params["wf2"][l]) + params["bf2"][l]
        h2d = _layer_norm(y + x1, params["g2"][l], params["b2"][l])
    return h2d.reshape(B, T, H)


# --------------------------------- setup -----------------------------------

def _sinusoidal_pe(T, H):
    pos = np.arange(T, dtype=np.float32)[:, None]
    div = np.exp(np.arange(0, H, 2, dtype=np.float32) * (-math.log(10000.0) / H))
    pe = np.zeros((T, H), np.float32)
    pe[:, 0::2] = np.sin(pos * div)
    pe[:, 1::2] = np.cos(pos * div)
    return jnp.asarray(pe)


def init_params(key, num_inputs, hidden, num_layers, num_heads, seq_len):
    ff = 2 * hidden                    # ff_hidden_mult = 2
    HH = num_heads * hidden
    ks = jax.random.split(key, 1 + 8 * num_layers)
    scale = 1.0 / math.sqrt(float(hidden))

    def rnd(k, shape, s=0.1):
        return s * jax.random.normal(k, shape, jnp.float32)

    names = ("wqkv", "wu", "bu", "g1", "b1", "wf1", "bf1", "wf2", "bf2", "g2", "b2")
    mxu_weights = ("wqkv", "wu", "wf1", "wf2")         # streamed as bf16
    layers = {n: [] for n in names}
    for l in range(num_layers):
        k = ks[1 + 8 * l: 1 + 8 * (l + 1)]
        wq = rnd(k[0], (hidden, HH)) * scale           # fold 1/sqrt(H) into Wq
        wk = rnd(k[1], (hidden, HH))
        wv = rnd(k[2], (hidden, HH))
        layers["wqkv"].append(jnp.concatenate([wq, wk, wv], axis=1))
        layers["wu"].append(rnd(k[3], (HH, hidden)))
        layers["bu"].append(rnd(k[4], (1, hidden), 0.01))
        layers["g1"].append(jnp.ones((1, hidden), jnp.float32))
        layers["b1"].append(jnp.zeros((1, hidden), jnp.float32))
        layers["wf1"].append(rnd(k[5], (hidden, ff)))
        layers["bf1"].append(rnd(k[6], (1, ff), 0.01))
        layers["wf2"].append(rnd(k[7], (ff, hidden)))
        layers["bf2"].append(jnp.zeros((1, hidden), jnp.float32))
        layers["g2"].append(jnp.ones((1, hidden), jnp.float32))
        layers["b2"].append(jnp.zeros((1, hidden), jnp.float32))

    params = {
        "w_emb": rnd(ks[0], (num_inputs, hidden)).astype(jnp.bfloat16),
        "b_emb": jnp.zeros((1, hidden), jnp.float32),
        "pe": _sinusoidal_pe(seq_len, hidden),
    }
    for n in names:
        w = jnp.stack(layers[n], axis=0)               # leading layer axis
        params[n] = w.astype(jnp.bfloat16) if n in mxu_weights else w
    return params


if __name__ == "__main__":
    B, T = 2, 8
    num_inputs, hidden_dims, num_layers, num_heads = 12, 32, 2, 2

    key = jax.random.PRNGKey(0)
    kp, kx = jax.random.split(key)
    params = init_params(kp, num_inputs, hidden_dims, num_layers, num_heads, T)
    x = jax.random.normal(kx, (B, T, num_inputs), jnp.float32)

    out = jax.block_until_ready(transformer_net(x, params, heads=num_heads))
    ref = jax.block_until_ready(_ref_net(x, params, num_heads))

    assert out.shape == (B, T, hidden_dims)
    diff = float(np.max(np.abs(np.asarray(out) - np.asarray(ref))))
    # bf16 MXU operands + approx reciprocal => loosened tolerance vs the f32 check.
    assert np.allclose(np.asarray(out), np.asarray(ref), atol=1e-2, rtol=1e-2), diff
    print("KERNEL_OK")
</pallas_src>

<mosaic_0001>
module attributes {stable_mosaic.version = 11 : i64} {
  func.func @_fused_net_kernel(%arg0: i32, %arg1: i32, %arg2: memref<1x8x12xf32, #tpu.memory_space<vmem>>, %arg3: memref<12x32xbf16, #tpu.memory_space<vmem>>, %arg4: memref<1x32xf32, #tpu.memory_space<vmem>>, %arg5: memref<8x32xf32, #tpu.memory_space<vmem>>, %arg6: memref<1x32x192xbf16, #tpu.memory_space<vmem>>, %arg7: memref<1x64x32xbf16, #tpu.memory_space<vmem>>, %arg8: memref<1x1x32xf32, #tpu.memory_space<vmem>>, %arg9: memref<1x1x32xf32, #tpu.memory_space<vmem>>, %arg10: memref<1x1x32xf32, #tpu.memory_space<vmem>>, %arg11: memref<1x32x64xbf16, #tpu.memory_space<vmem>>, %arg12: memref<1x1x64xf32, #tpu.memory_space<vmem>>, %arg13: memref<1x64x32xbf16, #tpu.memory_space<vmem>>, %arg14: memref<1x1x32xf32, #tpu.memory_space<vmem>>, %arg15: memref<1x1x32xf32, #tpu.memory_space<vmem>>, %arg16: memref<1x1x32xf32, #tpu.memory_space<vmem>>, %arg17: memref<1x8x32xf32, #tpu.memory_space<vmem>>, %arg18: memref<8x64xbf16, #tpu.memory_space<vmem>>) attributes {dimension_semantics = [#tpu.dimension_semantics<parallel>, #tpu.dimension_semantics<arbitrary>], iteration_bounds = array<i64: 2, 2>, scalar_prefetch = 0 : i64, scratch_operands = 1 : i64, tpu.core_type = #tpu.core_type<tc>, window_params = [{transform_indices = @transform_0, window_bounds = array<i64: 1, 8, 12>}, {pipeline_mode = #tpu.pipeline_mode<synchronous>, transform_indices = @transform_1, window_bounds = array<i64: 12, 32>}, {pipeline_mode = #tpu.pipeline_mode<synchronous>, transform_indices = @transform_2, window_bounds = array<i64: 1, 32>}, {pipeline_mode = #tpu.pipeline_mode<synchronous>, transform_indices = @transform_3, window_bounds = array<i64: 8, 32>}, {transform_indices = @transform_4, window_bounds = array<i64: 1, 32, 192>}, {transform_indices = @transform_5, window_bounds = array<i64: 1, 64, 32>}, {transform_indices = @transform_6, window_bounds = array<i64: 1, 1, 32>}, {transform_indices = @transform_7, window_bounds = array<i64: 1, 1, 32>}, {transform_indices = @transform_8, window_bounds = array<i64: 1, 1, 32>}, {transform_indices = @transform_9, window_bounds = array<i64: 1, 32, 64>}, {transform_indices = @transform_10, window_bounds = array<i64: 1, 1, 64>}, {transform_indices = @transform_11, window_bounds = array<i64: 1, 64, 32>}, {transform_indices = @transform_12, window_bounds = array<i64: 1, 1, 32>}, {transform_indices = @transform_13, window_bounds = array<i64: 1, 1, 32>}, {transform_indices = @transform_14, window_bounds = array<i64: 1, 1, 32>}, {transform_indices = @transform_15, window_bounds = array<i64: 1, 8, 32>}]} {
    %c0_i32 = arith.constant 0 : i32
    %0 = arith.cmpi eq, %arg1, %c0_i32 : i32
    %1 = arith.extui %0 : i1 to i32
    %c0_i32_0 = arith.constant 0 : i32
    %2 = arith.cmpi ne, %1, %c0_i32_0 : i32
    scf.if %2 {
      %c0_68 = arith.constant 0 : index
      %c0_69 = arith.constant 0 : index
      %c0_70 = arith.constant 0 : index
      %137 = vector.load %arg2[%c0_68, %c0_69, %c0_70] : memref<1x8x12xf32, #tpu.memory_space<vmem>>, vector<1x8x12xf32>
      %138 = vector.shape_cast %137 : vector<1x8x12xf32> to vector<8x12xf32>
      %c0_71 = arith.constant 0 : index
      %c0_72 = arith.constant 0 : index
      %139 = vector.load %arg3[%c0_71, %c0_72] : memref<12x32xbf16, #tpu.memory_space<vmem>>, vector<12x32xbf16>
      %140 = arith.truncf %138 : vector<8x12xf32> to vector<8x12xbf16>
      %cst_73 = arith.constant dense<0.000000e+00> : vector<8x32xf32>
      %141 = tpu.matmul %140, %139, %cst_73 {dimension_numbers = #tpu.dot_dimension_numbers<[1], [0], [0], [1], [0, 0, 1, 1], [], []>} : vector<8x12xbf16>, vector<12x32xbf16>, vector<8x32xf32> -> vector<8x32xf32>
      %c0_74 = arith.constant 0 : index
      %c0_75 = arith.constant 0 : index
      %142 = vector.load %arg4[%c0_74, %c0_75] : memref<1x32xf32, #tpu.memory_space<vmem>>, vector<1x32xf32>
      %143 = vector.broadcast %142 : vector<1x32xf32> to vector<8x32xf32>
      %144 = arith.addf %141, %143 : vector<8x32xf32>
      %c0_76 = arith.constant 0 : index
      %c0_77 = arith.constant 0 : index
      %145 = vector.load %arg5[%c0_76, %c0_77] : memref<8x32xf32, #tpu.memory_space<vmem>>, vector<8x32xf32>
      %146 = arith.addf %144, %145 : vector<8x32xf32>
      %c0_78 = arith.constant 0 : index
      %c0_79 = arith.constant 0 : index
      %c0_80 = arith.constant 0 : index
      %147 = vector.load %arg17[%c0_78, %c0_79, %c0_80] : memref<1x8x32xf32, #tpu.memory_space<vmem>>, vector<1x8x32xf32>
      %148 = vector.shape_cast %147 : vector<1x8x32xf32> to vector<8x32xf32>
      %149 = vector.shape_cast %146 : vector<8x32xf32> to vector<1x8x32xf32>
      tpu.vector_store %arg17[%c0_78, %c0_79, %c0_80], %149 {strides = array<i32>} : memref<1x8x32xf32, #tpu.memory_space<vmem>>, vector<1x8x32xf32>,
    } else {
    }
    %c0 = arith.constant 0 : index
    %c0_1 = arith.constant 0 : index
    %c0_2 = arith.constant 0 : index
    %3 = vector.load %arg17[%c0, %c0_1, %c0_2] : memref<1x8x32xf32, #tpu.memory_space<vmem>>, vector<1x8x32xf32>
    %4 = vector.shape_cast %3 : vector<1x8x32xf32> to vector<8x32xf32>
    %5 = tpu.iota {dimensions = array<i32: 0>} : vector<8x8xi32>
    %6 = tpu.iota {dimensions = array<i32: 1>} : vector<8x8xi32>
    %7 = arith.cmpi sle, %6, %5 : vector<8x8xi32>
    %cst = arith.constant 0.000000e+00 : f32
    %cst_3 = arith.constant -1.000000e+30 : f32
    %8 = vector.broadcast %cst : f32 to vector<8x8xf32>
    %9 = vector.broadcast %cst_3 : f32 to vector<8x8xf32>
    %10 = arith.select %7, %8, %9 : vector<8x8xi1>, vector<8x8xf32>
    %c0_4 = arith.constant 0 : index
    %c0_5 = arith.constant 0 : index
    %c0_6 = arith.constant 0 : index
    %11 = vector.load %arg6[%c0_4, %c0_5, %c0_6] : memref<1x32x192xbf16, #tpu.memory_space<vmem>>, vector<1x32x192xbf16>
    %12 = vector.shape_cast %11 : vector<1x32x192xbf16> to vector<32x192xbf16>
    %13 = arith.truncf %4 : vector<8x32xf32> to vector<8x32xbf16>
    %cst_7 = arith.constant dense<0.000000e+00> : vector<8x192xf32>
    %14 = tpu.matmul %13, %12, %cst_7 {dimension_numbers = #tpu.dot_dimension_numbers<[1], [0], [0], [1], [0, 0, 1, 1], [], []>} : vector<8x32xbf16>, vector<32x192xbf16>, vector<8x192xf32> -> vector<8x192xf32>
    %15 = arith.truncf %14 : vector<8x192xf32> to vector<8x192xbf16>
    %16 = vector.extract_strided_slice %15 {offsets = [0, 0], sizes = [8, 32], strides = [1, 1]} : vector<8x192xbf16> to vector<8x32xbf16>
    %17 = vector.extract_strided_slice %15 {offsets = [0, 64], sizes = [8, 32], strides = [1, 1]} : vector<8x192xbf16> to vector<8x32xbf16>
    %18 = vector.extract_strided_slice %15 {offsets = [0, 128], sizes = [8, 32], strides = [1, 1]} : vector<8x192xbf16> to vector<8x32xbf16>
    %cst_8 = arith.constant dense<0.000000e+00> : vector<8x8xf32>
    %19 = tpu.matmul %16, %17, %cst_8 {dimension_numbers = #tpu.dot_dimension_numbers<[1], [1], [0], [0], [0, 0, 1, 0], [], []>} : vector<8x32xbf16>, vector<8x32xbf16>, vector<8x8xf32> -> vector<8x8xf32>
    %20 = arith.addf %19, %10 : vector<8x8xf32>
    %cst_9 = arith.constant dense<0xFF800000> : vector<8xf32>
    %21 = vector.multi_reduction <maximumf>, %20, %cst_9 [1] : vector<8x8xf32> to vector<8xf32>
    %22 = vector.shape_cast %21 : vector<8xf32> to vector<8x1xf32>
    %23 = vector.broadcast %22 : vector<8x1xf32> to vector<8x8xf32>
    %24 = arith.subf %20, %23 : vector<8x8xf32>
    %25 = math.exp %24 : vector<8x8xf32>
    %cst_10 = arith.constant dense<0.000000e+00> : vector<8xf32>
    %26 = vector.multi_reduction <add>, %25, %cst_10 [1] : vector<8x8xf32> to vector<8xf32>
    %27 = vector.shape_cast %26 : vector<8xf32> to vector<8x1xf32>
    %28 = tpu.reciprocal %27 {approx = true} : vector<8x1xf32> -> vector<8x1xf32>
    %29 = vector.broadcast %28 : vector<8x1xf32> to vector<8x8xf32>
    %30 = arith.mulf %25, %29 : vector<8x8xf32>
    %31 = arith.truncf %30 : vector<8x8xf32> to vector<8x8xbf16>
    %cst_11 = arith.constant dense<0.000000e+00> : vector<8x32xf32>
    %32 = tpu.matmul %31, %18, %cst_11 {dimension_numbers = #tpu.dot_dimension_numbers<[1], [0], [0], [1], [0, 0, 1, 1], [], []>} : vector<8x8xbf16>, vector<8x32xbf16>, vector<8x32xf32> -> vector<8x32xf32>
    %33 = arith.truncf %32 : vector<8x32xf32> to vector<8x32xbf16>
    %c0_12 = arith.constant 0 : index
    %c0_13 = arith.constant 0 : index
    %34 = vector.load %arg18[%c0_12, %c0_13] : memref<8x64xbf16, #tpu.memory_space<vmem>>, vector<8x32xbf16>
    tpu.vector_store %arg18[%c0_12, %c0_13], %33 {strides = array<i32>} : memref<8x64xbf16, #tpu.memory_space<vmem>>, vector<8x32xbf16>,
    %35 = vector.extract_strided_slice %15 {offsets = [0, 32], sizes = [8, 32], strides = [1, 1]} : vector<8x192xbf16> to vector<8x32xbf16>
    %36 = vector.extract_strided_slice %15 {offsets = [0, 96], sizes = [8, 32], strides = [1, 1]} : vector<8x192xbf16> to vector<8x32xbf16>
    %37 = vector.extract_strided_slice %15 {offsets = [0, 160], sizes = [8, 32], strides = [1, 1]} : vector<8x192xbf16> to vector<8x32xbf16>
    %cst_14 = arith.constant dense<0.000000e+00> : vector<8x8xf32>
    %38 = tpu.matmul %35, %36, %cst_14 {dimension_numbers = #tpu.dot_dimension_numbers<[1], [1], [0], [0], [0, 0, 1, 0], [], []>} : vector<8x32xbf16>, vector<8x32xbf16>, vector<8x8xf32> -> vector<8x8xf32>
    %39 = arith.addf %38, %10 : vector<8x8xf32>
    %cst_15 = arith.constant dense<0xFF800000> : vector<8xf32>
    %40 = vector.multi_reduction <maximumf>, %39, %cst_15 [1] : vector<8x8xf32> to vector<8xf32>
    %41 = vector.shape_cast %40 : vector<8xf32> to vector<8x1xf32>
    %42 = vector.broadcast %41 : vector<8x1xf32> to vector<8x8xf32>
    %43 = arith.subf %39, %42 : vector<8x8xf32>
    %44 = math.exp %43 : vector<8x8xf32>
    %cst_16 = arith.constant dense<0.000000e+00> : vector<8xf32>
    %45 = vector.multi_reduction <add>, %44, %cst_16 [1] : vector<8x8xf32> to vector<8xf32>
    %46 = vector.shape_cast %45 : vector<8xf32> to vector<8x1xf32>
    %47 = tpu.reciprocal %46 {approx = true} : vector<8x1xf32> -> vector<8x1xf32>
    %48 = vector.broadcast %47 : vector<8x1xf32> to vector<8x8xf32>
    %49 = arith.mulf %44, %48 : vector<8x8xf32>
    %50 = arith.truncf %49 : vector<8x8xf32> to vector<8x8xbf16>
    %cst_17 = arith.constant dense<0.000000e+00> : vector<8x32xf32>
    %51 = tpu.matmul %50, %37, %cst_17 {dimension_numbers = #tpu.dot_dimension_numbers<[1], [0], [0], [1], [0, 0, 1, 1], [], []>} : vector<8x8xbf16>, vector<8x32xbf16>, vector<8x32xf32> -> vector<8x32xf32>
    %52 = arith.truncf %51 : vector<8x32xf32> to vector<8x32xbf16>
    %c0_18 = arith.constant 0 : index
    %c32 = arith.constant 32 : index
    %53 = vector.load %arg18[%c0_18, %c32] : memref<8x64xbf16, #tpu.memory_space<vmem>>, vector<8x32xbf16>
    tpu.vector_store %arg18[%c0_18, %c32], %52 {strides = array<i32>} : memref<8x64xbf16, #tpu.memory_space<vmem>>, vector<8x32xbf16>,
    %c0_19 = arith.constant 0 : index
    %c0_20 = arith.constant 0 : index
    %54 = vector.load %arg18[%c0_19, %c0_20] : memref<8x64xbf16, #tpu.memory_space<vmem>>, vector<8x64xbf16>
    %c0_21 = arith.constant 0 : index
    %c0_22 = arith.constant 0 : index
    %c0_23 = arith.constant 0 : index
    %55 = vector.load %arg7[%c0_21, %c0_22, %c0_23] : memref<1x64x32xbf16, #tpu.memory_space<vmem>>, vector<1x64x32xbf16>
    %56 = vector.shape_cast %55 : vector<1x64x32xbf16> to vector<64x32xbf16>
    %cst_24 = arith.constant dense<0.000000e+00> : vector<8x32xf32>
    %57 = tpu.matmul %54, %56, %cst_24 {dimension_numbers = #tpu.dot_dimension_numbers<[1], [0], [0], [1], [0, 0, 1, 1], [], []>} : vector<8x64xbf16>, vector<64x32xbf16>, vector<8x32xf32> -> vector<8x32xf32>
    %c0_25 = arith.constant 0 : index
    %c0_26 = arith.constant 0 : index
    %c0_27 = arith.constant 0 : index
    %58 = vector.load %arg8[%c0_25, %c0_26, %c0_27] : memref<1x1x32xf32, #tpu.memory_space<vmem>>, vector<1x1x32xf32>
    %59 = vector.shape_cast %58 : vector<1x1x32xf32> to vector<1x32xf32>
    %60 = vector.broadcast %59 : vector<1x32xf32> to vector<8x32xf32>
    %61 = arith.addf %57, %60 : vector<8x32xf32>
    %62 = arith.addf %61, %4 : vector<8x32xf32>
    %c0_28 = arith.constant 0 : index
    %c0_29 = arith.constant 0 : index
    %c0_30 = arith.constant 0 : index
    %63 = vector.load %arg9[%c0_28, %c0_29, %c0_30] : memref<1x1x32xf32, #tpu.memory_space<vmem>>, vector<1x1x32xf32>
    %64 = vector.shape_cast %63 : vector<1x1x32xf32> to vector<1x32xf32>
    %c0_31 = arith.constant 0 : index
    %c0_32 = arith.constant 0 : index
    %c0_33 = arith.constant 0 : index
    %65 = vector.load %arg10[%c0_31, %c0_32, %c0_33] : memref<1x1x32xf32, #tpu.memory_space<vmem>>, vector<1x1x32xf32>
    %66 = vector.shape_cast %65 : vector<1x1x32xf32> to vector<1x32xf32>
    %cst_34 = arith.constant dense<0.000000e+00> : vector<8xf32>
    %67 = vector.multi_reduction <add>, %62, %cst_34 [1] : vector<8x32xf32> to vector<8xf32>
    %68 = vector.shape_cast %67 : vector<8xf32> to vector<8x1xf32>
    %cst_35 = arith.constant 3.200000e+01 : f32
    %69 = vector.broadcast %cst_35 : f32 to vector<8x1xf32>
    %70 = arith.divf %68, %69 : vector<8x1xf32>
    %71 = vector.broadcast %70 : vector<8x1xf32> to vector<8x32xf32>
    %72 = arith.subf %62, %71 : vector<8x32xf32>
    %73 = arith.mulf %72, %72 : vector<8x32xf32>
    %cst_36 = arith.constant dense<0.000000e+00> : vector<8xf32>
    %74 = vector.multi_reduction <add>, %73, %cst_36 [1] : vector<8x32xf32> to vector<8xf32>
    %75 = vector.shape_cast %74 : vector<8xf32> to vector<8x1xf32>
    %cst_37 = arith.constant 3.200000e+01 : f32
    %76 = vector.broadcast %cst_37 : f32 to vector<8x1xf32>
    %77 = arith.divf %75, %76 : vector<8x1xf32>
    %78 = vector.broadcast %70 : vector<8x1xf32> to vector<8x32xf32>
    %79 = arith.subf %62, %78 : vector<8x32xf32>
    %cst_38 = arith.constant 9.99999974E-6 : f32
    %80 = vector.broadcast %cst_38 : f32 to vector<8x1xf32>
    %81 = arith.addf %77, %80 : vector<8x1xf32>
    %82 = math.rsqrt %81 : vector<8x1xf32>
    %83 = vector.broadcast %82 : vector<8x1xf32> to vector<8x32xf32>
    %84 = arith.mulf %79, %83 : vector<8x32xf32>
    %85 = vector.broadcast %64 : vector<1x32xf32> to vector<8x32xf32>
    %86 = arith.mulf %84, %85 : vector<8x32xf32>
    %87 = vector.broadcast %66 : vector<1x32xf32> to vector<8x32xf32>
    %88 = arith.addf %86, %87 : vector<8x32xf32>
    %c0_39 = arith.constant 0 : index
    %c0_40 = arith.constant 0 : index
    %c0_41 = arith.constant 0 : index
    %89 = vector.load %arg11[%c0_39, %c0_40, %c0_41] : memref<1x32x64xbf16, #tpu.memory_space<vmem>>, vector<1x32x64xbf16>
    %90 = vector.shape_cast %89 : vector<1x32x64xbf16> to vector<32x64xbf16>
    %91 = arith.truncf %88 : vector<8x32xf32> to vector<8x32xbf16>
    %cst_42 = arith.constant dense<0.000000e+00> : vector<8x64xf32>
    %92 = tpu.matmul %91, %90, %cst_42 {dimension_numbers = #tpu.dot_dimension_numbers<[1], [0], [0], [1], [0, 0, 1, 1], [], []>} : vector<8x32xbf16>, vector<32x64xbf16>, vector<8x64xf32> -> vector<8x64xf32>
    %c0_43 = arith.constant 0 : index
    %c0_44 = arith.constant 0 : index
    %c0_45 = arith.constant 0 : index
    %93 = vector.load %arg12[%c0_43, %c0_44, %c0_45] : memref<1x1x64xf32, #tpu.memory_space<vmem>>, vector<1x1x64xf32>
    %94 = vector.shape_cast %93 : vector<1x1x64xf32> to vector<1x64xf32>
    %95 = vector.broadcast %94 : vector<1x64xf32> to vector<8x64xf32>
    %96 = arith.addf %92, %95 : vector<8x64xf32>
    %cst_46 = arith.constant 0.000000e+00 : f32
    %97 = vector.broadcast %cst_46 : f32 to vector<8x64xf32>
    %98 = arith.maximumf %96, %97 : vector<8x64xf32>
    %c0_47 = arith.constant 0 : index
    %c0_48 = arith.constant 0 : index
    %c0_49 = arith.constant 0 : index
    %99 = vector.load %arg13[%c0_47, %c0_48, %c0_49] : memref<1x64x32xbf16, #tpu.memory_space<vmem>>, vector<1x64x32xbf16>
    %100 = vector.shape_cast %99 : vector<1x64x32xbf16> to vector<64x32xbf16>
    %101 = arith.truncf %98 : vector<8x64xf32> to vector<8x64xbf16>
    %cst_50 = arith.constant dense<0.000000e+00> : vector<8x32xf32>
    %102 = tpu.matmul %101, %100, %cst_50 {dimension_numbers = #tpu.dot_dimension_numbers<[1], [0], [0], [1], [0, 0, 1, 1], [], []>} : vector<8x64xbf16>, vector<64x32xbf16>, vector<8x32xf32> -> vector<8x32xf32>
    %c0_51 = arith.constant 0 : index
    %c0_52 = arith.constant 0 : index
    %c0_53 = arith.constant 0 : index
    %103 = vector.load %arg14[%c0_51, %c0_52, %c0_53] : memref<1x1x32xf32, #tpu.memory_space<vmem>>, vector<1x1x32xf32>
    %104 = vector.shape_cast %103 : vector<1x1x32xf32> to vector<1x32xf32>
    %105 = vector.broadcast %104 : vector<1x32xf32> to vector<8x32xf32>
    %106 = arith.addf %102, %105 : vector<8x32xf32>
    %107 = arith.addf %106, %88 : vector<8x32xf32>
    %c0_54 = arith.constant 0 : index
    %c0_55 = arith.constant 0 : index
    %c0_56 = arith.constant 0 : index
    %108 = vector.load %arg15[%c0_54, %c0_55, %c0_56] : memref<1x1x32xf32, #tpu.memory_space<vmem>>, vector<1x1x32xf32>
    %109 = vector.shape_cast %108 : vector<1x1x32xf32> to vector<1x32xf32>
    %c0_57 = arith.constant 0 : index
    %c0_58 = arith.constant 0 : index
    %c0_59 = arith.constant 0 : index
    %110 = vector.load %arg16[%c0_57, %c0_58, %c0_59] : memref<1x1x32xf32, #tpu.memory_space<vmem>>, vector<1x1x32xf32>
    %111 = vector.shape_cast %110 : vector<1x1x32xf32> to vector<1x32xf32>
    %cst_60 = arith.constant dense<0.000000e+00> : vector<8xf32>
    %112 = vector.multi_reduction <add>, %107, %cst_60 [1] : vector<8x32xf32> to vector<8xf32>
    %113 = vector.shape_cast %112 : vector<8xf32> to vector<8x1xf32>
    %cst_61 = arith.constant 3.200000e+01 : f32
    %114 = vector.broadcast %cst_61 : f32 to vector<8x1xf32>
    %115 = arith.divf %113, %114 : vector<8x1xf32>
    %116 = vector.broadcast %115 : vector<8x1xf32> to vector<8x32xf32>
    %117 = arith.subf %107, %116 : vector<8x32xf32>
    %118 = arith.mulf %117, %117 : vector<8x32xf32>
    %cst_62 = arith.constant dense<0.000000e+00> : vector<8xf32>
    %119 = vector.multi_reduction <add>, %118, %cst_62 [1] : vector<8x32xf32> to vector<8xf32>
    %120 = vector.shape_cast %119 : vector<8xf32> to vector<8x1xf32>
    %cst_63 = arith.constant 3.200000e+01 : f32
    %121 = vector.broadcast %cst_63 : f32 to vector<8x1xf32>
    %122 = arith.divf %120, %121 : vector<8x1xf32>
    %123 = vector.broadcast %115 : vector<8x1xf32> to vector<8x32xf32>
    %124 = arith.subf %107, %123 : vector<8x32xf32>
    %cst_64 = arith.constant 9.99999974E-6 : f32
    %125 = vector.broadcast %cst_64 : f32 to vector<8x1xf32>
    %126 = arith.addf %122, %125 : vector<8x1xf32>
    %127 = math.rsqrt %126 : vector<8x1xf32>
    %128 = vector.broadcast %127 : vector<8x1xf32> to vector<8x32xf32>
    %129 = arith.mulf %124, %128 : vector<8x32xf32>
    %130 = vector.broadcast %109 : vector<1x32xf32> to vector<8x32xf32>
    %131 = arith.mulf %129, %130 : vector<8x32xf32>
    %132 = vector.broadcast %111 : vector<1x32xf32> to vector<8x32xf32>
    %133 = arith.addf %131, %132 : vector<8x32xf32>
    %c0_65 = arith.constant 0 : index
    %c0_66 = arith.constant 0 : index
    %c0_67 = arith.constant 0 : index
    %134 = vector.load %arg17[%c0_65, %c0_66, %c0_67] : memref<1x8x32xf32, #tpu.memory_space<vmem>>, vector<1x8x32xf32>
    %135 = vector.shape_cast %134 : vector<1x8x32xf32> to vector<8x32xf32>
    %136 = vector.shape_cast %133 : vector<8x32xf32> to vector<1x8x32xf32>
    tpu.vector_store %arg17[%c0_65, %c0_66, %c0_67], %136 {strides = array<i32>} : memref<1x8x32xf32, #tpu.memory_space<vmem>>, vector<1x8x32xf32>,
    return
  }
  func.func @transform_0(%arg0: i32, %arg1: i32) -> (i32, i32, i32) {
    %c0_i32 = arith.constant 0 : i32
    %c0_i32_0 = arith.constant 0 : i32
    %c0_i32_1 = arith.constant 0 : i32
    return %arg0, %c0_i32, %c0_i32_0 : i32, i32, i32
  }
  func.func @transform_1(%arg0: i32, %arg1: i32) -> (i32, i32) {
    %c0_i32 = arith.constant 0 : i32
    %c0_i32_0 = arith.constant 0 : i32
    %c0_i32_1 = arith.constant 0 : i32
    return %c0_i32, %c0_i32_0 : i32, i32
  }
  func.func @transform_2(%arg0: i32, %arg1: i32) -> (i32, i32) {
    %c0_i32 = arith.constant 0 : i32
    %c0_i32_0 = arith.constant 0 : i32
    %c0_i32_1 = arith.constant 0 : i32
    return %c0_i32, %c0_i32_0 : i32, i32
  }
  func.func @transform_3(%arg0: i32, %arg1: i32) -> (i32, i32) {
    %c0_i32 = arith.constant 0 : i32
    %c0_i32_0 = arith.constant 0 : i32
    %c0_i32_1 = arith.constant 0 : i32
    return %c0_i32, %c0_i32_0 : i32, i32
  }
  func.func @transform_4(%arg0: i32, %arg1: i32) -> (i32, i32, i32) {
    %c0_i32 = arith.constant 0 : i32
    %c0_i32_0 = arith.constant 0 : i32
    %c0_i32_1 = arith.constant 0 : i32
    return %arg1, %c0_i32, %c0_i32_0 : i32, i32, i32
  }
  func.func @transform_5(%arg0: i32, %arg1: i32) -> (i32, i32, i32) {
    %c0_i32 = arith.constant 0 : i32
    %c0_i32_0 = arith.constant 0 : i32
    %c0_i32_1 = arith.constant 0 : i32
    return %arg1, %c0_i32, %c0_i32_0 : i32, i32, i32
  }
  func.func @transform_6(%arg0: i32, %arg1: i32) -> (i32, i32, i32) {
    %c0_i32 = arith.constant 0 : i32
    %c0_i32_0 = arith.constant 0 : i32
    %c0_i32_1 = arith.constant 0 : i32
    return %arg1, %c0_i32, %c0_i32_0 : i32, i32, i32
  }
  func.func @transform_7(%arg0: i32, %arg1: i32) -> (i32, i32, i32) {
    %c0_i32 = arith.constant 0 : i32
    %c0_i32_0 = arith.constant 0 : i32
    %c0_i32_1 = arith.constant 0 : i32
    return %arg1, %c0_i32, %c0_i32_0 : i32, i32, i32
  }
  func.func @transform_8(%arg0: i32, %arg1: i32) -> (i32, i32, i32) {
    %c0_i32 = arith.constant 0 : i32
    %c0_i32_0 = arith.constant 0 : i32
    %c0_i32_1 = arith.constant 0 : i32
    return %arg1, %c0_i32, %c0_i32_0 : i32, i32, i32
  }
  func.func @transform_9(%arg0: i32, %arg1: i32) -> (i32, i32, i32) {
    %c0_i32 = arith.constant 0 : i32
    %c0_i32_0 = arith.constant 0 : i32
    %c0_i32_1 = arith.constant 0 : i32
    return %arg1, %c0_i32, %c0_i32_0 : i32, i32, i32
  }
  func.func @transform_10(%arg0: i32, %arg1: i32) -> (i32, i32, i32) {
    %c0_i32 = arith.constant 0 : i32
    %c0_i32_0 = arith.constant 0 : i32
    %c0_i32_1 = arith.constant 0 : i32
    return %arg1, %c0_i32, %c0_i32_0 : i32, i32, i32
  }
  func.func @transform_11(%arg0: i32, %arg1: i32) -> (i32, i32, i32) {
    %c0_i32 = arith.constant 0 : i32
    %c0_i32_0 = arith.constant 0 : i32
    %c0_i32_1 = arith.constant 0 : i32
    return %arg1, %c0_i32, %c0_i32_0 : i32, i32, i32
  }
  func.func @transform_12(%arg0: i32, %arg1: i32) -> (i32, i32, i32) {
    %c0_i32 = arith.constant 0 : i32
    %c0_i32_0 = arith.constant 0 : i32
    %c0_i32_1 = arith.constant 0 : i32
    return %arg1, %c0_i32, %c0_i32_0 : i32, i32, i32
  }
  func.func @transform_13(%arg0: i32, %arg1: i32) -> (i32, i32, i32) {
    %c0_i32 = arith.constant 0 : i32
    %c0_i32_0 = arith.constant 0 : i32
    %c0_i32_1 = arith.constant 0 : i32
    return %arg1, %c0_i32, %c0_i32_0 : i32, i32, i32
  }
  func.func @transform_14(%arg0: i32, %arg1: i32) -> (i32, i32, i32) {
    %c0_i32 = arith.constant 0 : i32
    %c0_i32_0 = arith.constant 0 : i32
    %c0_i32_1 = arith.constant 0 : i32
    return %arg1, %c0_i32, %c0_i32_0 : i32, i32, i32
  }
  func.func @transform_15(%arg0: i32, %arg1: i32) -> (i32, i32, i32) {
    %c0_i32 = arith.constant 0 : i32
    %c0_i32_0 = arith.constant 0 : i32
    %c0_i32_1 = arith.constant 0 : i32
    return %arg0, %c0_i32, %c0_i32_0 : i32, i32, i32
  }
}

</mosaic_0001>

<bundles_post_ra>
// kernel: transformer_net.1
= control target key start
LH: loop header
LB: loop body
LE: loop exit
PB: predicated region body
PF: predicated region fallthrough
CT: control target
= control target key end

     0   :  { %s2292_s0 = inlined_call_operand.vmem [shape: f32[2,8,12], index: 0, kind: input, shape index: {}]   ;;  %s2293_s1 = inlined_call_operand.vmem [shape: bf16[12,32], index: 1, kind: input, shape index: {}]   ;;  %s2294_s2 = inlined_call_operand.vmem [shape: f32[1,32], index: 2, kind: input, shape index: {}]   ;;  %s2295_s3 = inlined_call_operand.vmem [shape: f32[8,32], index: 3, kind: input, shape index: {}]   ;;  %s2296_s4 = inlined_call_operand.vmem [shape: bf16[2,32,192], index: 4, kind: input, shape index: {}]   ;;  %s2297_s5 = inlined_call_operand.vmem [shape: bf16[2,64,32], index: 5, kind: input, shape index: {}]   ;;  %s2298_s6 = inlined_call_operand.vmem [shape: f32[2,1,32], index: 6, kind: input, shape index: {}]   ;;  %s2299_s7 = inlined_call_operand.vmem [shape: f32[2,1,32], index: 7, kind: input, shape index: {}]   ;;  %s2300_s8 = inlined_call_operand.vmem [shape: f32[2,1,32], index: 8, kind: input, shape index: {}]   ;;  %s2301_s9 = inlined_call_operand.vmem [shape: bf16[2,32,64], index: 9, kind: input, shape index: {}]   ;;  %s2302_s10 = inlined_call_operand.vmem [shape: f32[2,1,64], index: 10, kind: input, shape index: {}]   ;;  %s2303_s11 = inlined_call_operand.vmem [shape: bf16[2,64,32], index: 11, kind: input, shape index: {}]   ;;  %s2304_s12 = inlined_call_operand.vmem [shape: f32[2,1,32], index: 12, kind: input, shape index: {}]   ;;  %s2305_s13 = inlined_call_operand.vmem [shape: f32[2,1,32], index: 13, kind: input, shape index: {}]   ;;  %s2306_s14 = inlined_call_operand.vmem [shape: f32[2,1,32], index: 14, kind: input, shape index: {}]   ;;  %s2307_s15 = inlined_call_operand.hbm [shape: f32[2,8,32], index: 15, kind: output, shape index: {}]  }
   0x1   :  { %2323 = sst [smem:[#allocation19_spill]] %s2292_s0 }
   0x2   :  { %2324 = sst [smem:[#allocation20_spill]] %s2293_s1 }
   0x3   :  { %2325 = sst [smem:[#allocation21_spill]] %s2294_s2 }
   0x4   :  { %2326 = sst [smem:[#allocation22_spill]] %s2295_s3 }
   0x5   :  { %2327 = sst [smem:[#allocation23_spill]] %s2296_s4 }
   0x6   :  { %2328 = sst [smem:[#allocation24_spill]] %s2297_s5 }
   0x7   :  { %2329 = sst [smem:[#allocation25_spill]] %s2301_s9 }
   0x8   :  { %2330 = sst [smem:[#allocation26_spill]] %s2307_s15 }
   0x9   :  { %20 = vsyncpa [#allocation4], 0 }
   0xa   :  { %22 = vsyncpa [#allocation4 + $0x1], 0  ;;  %s1992_s18 = smov 0   ;;  %s1994_s19 = smov 0  }
   0xb   :  { %s1996_s20 = smov 0   ;;  %s1998_s21 = smov 0  }
   0xc   :  { %s2000_s22 = smov 0   ;;  %s2002_s23 = smov 0  }
   0xd   :  { %s2004_s24 = smov 0   ;;  %s2006_s25 = smov 0  }
   0xe LB: > { %2331 = sst [smem:[#allocation6_spill]] %s1872_s18  ;;  %s1556_s26 = sadd.s32 4294967295, %s1900_s25   ;;  %s1900_s25 = sphi %s2006_s25, %s28_s25   ;;  %s1896_s24 = sphi %s2004_s24, %s2371_s24   ;;  %s1892_s23 = sphi %s2002_s23, %s2370_s23   ;;  %s1888_s22 = sphi %s2000_s22, %s2369_s22   ;;  %s1884_s21 = sphi %s1998_s21, %s2368_s21   ;;  %s1880_s20 = sphi %s1996_s20, %s2367_s20   ;;  %s1876_s19 = sphi %s1994_s19, %s2366_s19   ;;  %s1872_s18 = sphi %s1992_s18, %s2365_s18  }
   0xf   : > { %2332 = sst [smem:[#allocation7_spill]] %s1876_s19  ;;  %s1557_s27 = sadd.s32 4294967294, %s1900_s25  }
  0x10   : > { %2333 = sst [smem:[#allocation8_spill]] %s1880_s20  ;;  %s37_s28 = sadd.s32 1, %s1892_s23 }
  0x11   : > { %2334 = sst [smem:[#allocation9_spill]] %s1888_s22  ;;  %p38_p0 = scmp.ge.s32.totalorder %s37_s28, 2 }
  0x12   : > { %2335 = sst [smem:[#allocation10_spill]] %s1892_s23  ;;  %s40_s29 = sadd.s32 1, %s1896_s24 }
  0x13   : > { %2336 = sst [smem:[#allocation11_spill]] %s1896_s24  ;;  %p432_p1 = scmp.ne.s32.totalorder %s1880_s20, %s1876_s19 }
  0x14   : > { %2337 = sst [smem:[#allocation12_spill]] %s1900_s25  ;;  %p433_p2 = scmp.eq.s32.totalorder %s1556_s26, 3 }
  0x15   : > { %s2373_s28 = smov (%p38_p0, %s37_s28), 0  ;;  %s2375_s29 = smov (!%p38_p0, %s40_s29), %s1896_s24 }
  0x16   : > { %2338 = sst [smem:[#allocation13_spill]] %s2373_s28  ;;  %p2041_p3 = por %p433_p2, %p432_p1 }
  0x17   : > { %p438_p4 = scmp.ne.s32.totalorder %s1876_s19, %s1872_s18  ;;  %p42_p5 = scmp.ge.s32.totalorder %s2375_s29, 2 }
  0x18   : > { %s2339_s30 = scalar_select %p2041_p3, 1, 0 }
  0x19   : > { %p439_p6 = scmp.eq.s32.totalorder %s1557_s27, 3  ;;  %p1560_p7 = scmp.ge.s32.totalorder %s1900_s25, 1 }
  0x1a   : > { %2340 = sst [smem:[#allocation14_spill]] %s2339_s30  ;;  %p547_p8 = scmp.lt.s32.totalorder %s1900_s25, 5 }
  0x1b   : > { %s2377_s29 = smov (%p42_p5, %s2375_s29), 0  ;;  %p2051_p9 = por %p439_p6, %p438_p4 }
  0x1c   : > { %2341 = sst [smem:[#allocation15_spill]] %s2377_s29  ;;  %p548_p10 = pnand %p1560_p7, %p547_p8 }
  0x1d   : > { %s2342_s16 = scalar_select %p2051_p9, 1, 0 }
  0x1e   : > { %s419_s17 = ssub.s32 %s1896_s24, %s2377_s29  ;;  %s422_s26 = sadd.s32 1, %s1880_s20 }
  0x1f   : > { %2343 = sst [smem:[#allocation16_spill]] %s2342_s16  ;;  %p420_p11 = scmp.eq.s32.totalorder %s419_s17, 0 }
  0x20   : > { %551 = sbr.rel (%p548_p10) target bundleno = 2653 (0xa5d), region = 80 }
  0x21   : > { %s2059_s28 = scalar_select %p420_p11, %s1880_s20, %s422_s26  }
  0x23   : > { %2344 = sst [smem:[#allocation17_spill]] %s2059_s28 }
  0x25   : > { %s2313_s27 = sand.u32 1, %s1876_s19   ;;  %p635_p12 = scmp.lt.s32.totalorder %s1888_s22, 1 }
  0x26   : > { %s1561_s23 = sshll.u32 %s2313_s27, 3  ;;  %p639_p13 = scmp.lt.s32.totalorder %s1884_s21, 1 }
  0x27   : > { %s636_s18 = scalar_select %p635_p12, %s1888_s22, 1 }
  0x28   : > { %s2068_s16 = scalar_select %p639_p13, %s1884_s21, 1 }
  0x29   : > { %s1562_s17 = sshll.u32 %s636_s18, 3  ;;  %s2345_s0 = sld [smem:[#allocation19_spill]] }
  0x2a   : > { %s1609_s28 = sshll.u32 %s2068_s16, 5  ;;  %s2346_s4 = sld [smem:[#allocation23_spill]] }
  0x2b   : > { %s2348_s5 = sld [smem:[#allocation24_spill]]  ;;  %s1611_s20 = sshll.u32 %s2068_s16, 4 }
  0x2c   : > { %s2349_s9 = sld [smem:[#allocation25_spill]]  ;;  %s2109_s2 = scalar_lea.vmem %s2303_s11, %s1609_s28 }
  0x2d   : > { %s676_s29 = scalar_lea.vmem %s2305_s13, %s2068_s16  ;;  %s679_s27 = scalar_lea.vmem %s2306_s14, %s2068_s16 }
  0x2e   : > { %p1571_p0 = scmp.ne.s32.totalorder %s1884_s21, 0 }
  0x2f   : > { %s638_s24 = scalar_lea.vmem %s2345_s0, %s1562_s17  ;;  %s673_s17 = scalar_lea.vmem %s2304_s12, %s2068_s16 }
  0x30   : > { %s2077_s25 = scalar_lea.vmem %s2346_s4, %s1609_s28  ;;  %684 = sbr.rel (%p1571_p0) target bundleno = 261 (0x105), region = 84 }
  0x31   : > { %2347 = sst [smem:[#allocation18_spill]] %s2077_s25  ;;  %s2082_s19 = scalar_lea.vmem %s2348_s5, %s1609_s28 }
  0x32   : > { %s2100_s25 = scalar_lea.vmem %s2349_s9, %s1611_s20  ;;  %s665_s5 = scalar_lea.vmem %s2302_s10, %s2068_s16 }
  0x33   : > { %s2123_s9 = scalar_lea.vmem [#allocation3], %s1561_s23  ;;  %s2350_s30 = sld [smem:[#allocation20_spill]] (!%p1571_p0) }
  0x34   : > { %s2351_s21 = sld [smem:[#allocation21_spill]] (!%p1571_p0) }
  0x35   : > { %vm705_vm0 = vcmask 1045504   ;;  %v1902_v0 = vmov 0.0   ;;  %v685_v2 = vld [vmem:[%s638_s24] sm:$0xff]  ;;  %vm1903_vm1 = vmmov 0   ;;  %vm701_vm2 = vcmask 97280   ;;  %s2352_s1 = sld [smem:[#allocation22_spill]] }
  0x36   : > { %1637 = vmatprep.subr.bf16.mxu0 %v1902_v0  ;;  %1639 = vmatprep.mubr.msk.bf16.mxu0 %vm1903_vm1, %v1902_v0  ;;  %v688_v4 = vpack.c.bf16 %v685_v2, %v685_v2  ;;  %vm751_vm3 = vcmask 261120  }
  0x39   : > { %v1779_v1 = vld [vmem:[%s2350_s30] sm:$0x3f]  }
  0x3a   : > { %v707_v3 = vsel %vm705_vm0, %v1779_v1, 0  ;;  %v1572_v5 = vld [vmem:[%s2351_s21] ss:$0 sm:$0xff] }
  0x3b   : > { %1638 = vmatpush3.bf16.msra.mxu0 %v707_v3  ;;  %v749_v7 = vld [vmem:[%s2352_s1] sm:$0xff] }
  0x3e   : > { %1640 = vmatmul.mubr.msk.bf16.vlgmr.msra.gmra.mxu0 %vm701_vm2, %v688_v4 }
  0xfe   : > { %v743_v6 = vpop.f32.mrf.mxu0 }
  0xff   : > { %v744_v8 = vadd.f32 %v1572_v5, %v743_v6 }
 0x100   : > { %v1641_v9 = vpop.f32.mrf.mxu0 }
 0x101   : > { %v750_v10 = vadd.f32 %v749_v7, %v744_v8 }
 0x102   : > { %v746_v11 = vpop.f32.mrf.mxu0 }
 0x103   : > { %752 = vst.msk [vmem:[%s2123_s9] sm:$0xff] %vm751_vm3, %v750_v10 }
 0x104   : > { %v1642_v12 = vpop.f32.mrf.mxu0 }
 0x105 PF: > { %s2353_s24 = sld [smem:[#allocation18_spill]]  ;;  %v1904_v15 = vmov 0   ;;  %vm785_vm4 = vcmask 261120   ;;  %v1905_v20 = vmov 0.0   ;;  %vm1906_vm5 = vmmov 0   ;;  %s1907_s18 = smov 96  }
 0x106   : > { %821 = vmatprep.mubr.bf16.mxu1 %v1904_v15  ;;  %1649 = vmatprep.subr.bf16.mxu0 %v1905_v20  ;;  %vm897_vm6 = vcmask 1043456   ;;  %s1908_s26 = smov 64   ;;  %s1909_s4 = smov 32   ;;  %v754_v33 = vlaneseq  ;;  %v1910_v36 = vmov -1e+30   ;;  %vm881_vm8 = vcmask 64512  }
 0x107   : > { %1651 = vmatprep.mubr.msk.bf16.mxu0 %vm1906_vm5, %v1905_v20  ;;  %v1786_v6 = vld [vmem:[%s2082_s19 + $0x18] sm:$0xff]   ;;  %v1787_v7 = vld [vmem:[%s2082_s19 + $0x10] sm:$0xff]   ;;  %v1788_v8 = vld [vmem:[%s2082_s19 + $0x8] sm:$0xff]   ;;  %vm942_vm9 = vcmask 257024   ;;  %vm1062_vm10 = vcmask 519424   ;;  %vm1104_vm11 = vcmask 523264   ;;  %s2354_s28 = scalar_lea.vmem %s2298_s6, %s2068_s16  ;;  %s2355_s0 = scalar_lea.vmem %s2299_s7, %s2068_s16 }
 0x108   : > { %v755_v34 = vshrl.u32 %v754_v33, 7  ;;  %v757_v35 = vand.u32 127, %v754_v33  ;;  %v1789_v10 = vld [vmem:[%s2082_s19] sm:$0xff]   ;;  %s2356_s21 = scalar_lea.vmem %s2300_s8, %s2068_s16  ;;  %s1911_s16 = smov [#allocation3]  }
 0x10a   : > { %v2141_v18 = vld [vmem:[%s2123_s9] sm:$0xff]  ;;  %vm758_vm7 = vcmp.le.s32.totalorder %v757_v35, %v755_v34 }
 0x10b   : > { %v1780_v13 = vld [vmem:[%s2353_s24 + $0x14] ss:$8 sps:$4 sm:$0xff]   ;;  %v1782_v14 = vld [vmem:[%s2353_s24 + $0x10] ss:$8 sps:$4 sm:$0xff]   ;;  %v1783_v16 = vld [vmem:[%s2353_s24 + $0x4] ss:$8 sps:$4 sm:$0xff]   ;;  %v764_v19 = vpack.c.bf16 %v2141_v18, %v2141_v18 }
 0x10c   : > { %801 = vmatprep.subr.bf16.mxu1 %v1780_v13  ;;  %v1785_v17 = vld [vmem:[%s2353_s24] ss:$8 sps:$4 sm:$0xff]   ;;  %v759_v37 = vsel %vm758_vm7, 0.0, %v1910_v36 }
 0x10d   : > { %802 = vmatpush1.bf16.msra.mxu1 %v1782_v14 }
 0x10e   : > { %803 = vmatprep.subr.bf16.mxu1 %v1783_v16 }
 0x111   : > { %804 = vmatpush1.bf16.msra.mxu1 %v1785_v17 }
 0x112   : > { %1643 = vmatprep.subr.bf16.mxu1 %v1905_v20 }
 0x114   : > { %1579 = vmatmul.mubr.msk.bf16.vlgmr.msra.gmra.mxu1 %vm785_vm4, %v764_v19 }
 0x115   : > { %1645 = vmatprep.mubr.msk.bf16.mxu1 %vm1906_vm5, %v1905_v20 }
 0x1d4   : > { %v823_v21 = vpop.f32.mrf.mxu1 }
 0x1d5   : > { %v830_v22 = vpack.c.bf16 %v823_v21, %v823_v21 }
 0x1d6   : > { %v825_v23 = vpop.f32.mrf.mxu1 }
 0x1d7   : > { %v831_v24 = vpack.c.bf16 %v825_v23, %v825_v23  ;;  %944 = vrot.lane.b32.xlu1 %v830_v22, %s1907_s18  ;;  %833 = vrot.lane.b32.xlu0 %v830_v22, %s1908_s26 }
 0x1d8   : > { %v827_v25 = vpop.f32.mrf.mxu1 }
 0x1d9   : > { %v899_v26 = vsel %vm897_vm6, %v831_v24, 0 }
 0x1da   : > { %v828_v27 = vpop.f32.mrf.mxu1  ;;  %1650 = vmatpush3.bf16.msra.mxu0 %v899_v26 }
 0x1db   : > { %946 = vrot.lane.b32.xlu0 %v830_v22, %s1909_s4  ;;  %1661 = vmatprep.subr.bf16.mxu0 %v1905_v20 }
 0x249   : > { %v834_v28 = vpop.permute.xlu0 %833  ;;  %v945_v32 = vpop.permute.xlu1 %944 }
 0x24a   : > { %v839_v29 = vsel %vm785_vm4, %v834_v28, 0 }
 0x24b   : > { %1644 = vmatpush3.bf16.xpose.msra.mxu1 %v839_v29 }
 0x24c   : > { %1655 = vmatprep.subr.bf16.mxu1 %v1905_v20 }
 0x24d   : > { %v947_v30 = vpop.permute.xlu0 %946 }
 0x24e   : > { %v952_v31 = vsel %vm785_vm4, %v947_v30, 0 }
 0x252   : > { %1646 = vmatmul.mubr.msk.bf16.vlgmr.msra.gmra.mxu1 %vm785_vm4, %v830_v22 }
 0x253   : > { %1656 = vmatpush3.bf16.xpose.msra.mxu1 %v952_v31  ;;  %1657 = vmatprep.mubr.msk.bf16.mxu1 %vm1906_vm5, %v1905_v20 }
 0x254   : > { %1667 = vmatprep.subr.bf16.mxu1 %v1905_v20 }
 0x25a   : > { %1658 = vmatmul.mubr.msk.bf16.vlgmr.msra.gmra.mxu1 %vm785_vm4, %v945_v32 }
 0x25b   : > { %1675 = vmatprep.mubr.msk.bf16.mxu1 %vm1906_vm5, %v1905_v20  ;;  %1668 = vmatpush3.bf16.msra.mxu1 %v1786_v6 }
 0x25c   : > { %1669 = vmatprep.subr.bf16.mxu1 %v1905_v20 }
 0x25f   : > { %1670 = vmatpush3.bf16.msra.mxu1 %v1787_v7 }
 0x260   : > { %1671 = vmatprep.subr.bf16.mxu1 %v1905_v20 }
 0x263   : > { %1672 = vmatpush3.bf16.msra.mxu1 %v1788_v8 }
 0x264   : > { %1673 = vmatprep.subr.bf16.mxu1 %v1905_v20 }
 0x267   : > { %1674 = vmatpush3.bf16.msra.mxu1 %v1789_v10 }
 0x312   : > { %v875_v38 = vpop.f32.mrf.mxu1 }
 0x313   : > { %v876_v39 = vadd.f32 %v875_v38, %v759_v37  ;;  %v1791_v38 = vld [vmem:[%s2100_s25] sm:$0xff]  }
 0x314   : > { %v1647_v40 = vpop.f32.mrf.mxu1 }
 0x315   : > { %v882_v41 = vsel %vm881_vm8, %v876_v39, -inf }
 0x316   : > { %883 = vmax.xlane.f32.xlu1 %v882_v41  ;;  %v878_v42 = vpop.f32.mrf.mxu1 }
 0x317   : > { %v1591_v42 = vld [vmem:[%s2355_s0] ss:$0 sm:$0xff]  ;;  %s2360_s0 = sld [smem:[#allocation26_spill]] }
 0x318   : > { %v1648_v43 = vpop.f32.mrf.mxu1 }
 0x31a   : > { %v988_v44 = vpop.f32.mrf.mxu1 }
 0x31b   : > { %v989_v45 = vadd.f32 %v988_v44, %v759_v37  ;;  %v1790_v37 = vld [vmem:[%s2100_s25 + $0x8] sm:$0xff]   ;;  %v1592_v44 = vld [vmem:[%s2356_s21] ss:$0 sm:$0xff] }
 0x31c   : > { %v1659_v46 = vpop.f32.mrf.mxu1 }
 0x31d   : > { %v994_v47 = vsel %vm881_vm8, %v989_v45, -inf }
 0x31e   : > { %995 = vmax.xlane.f32.xlu0 %v994_v47  ;;  %v991_v48 = vpop.f32.mrf.mxu1  ;;  %v1792_v47 = vld [vmem:[%s2109_s2 + $0x18] sm:$0xff]  }
 0x320   : > { %v1660_v49 = vpop.f32.mrf.mxu1 }
 0x321   : > { %v1793_v49 = vld [vmem:[%s2109_s2 + $0x10] sm:$0xff]  }
 0x39f   : > { %v884_v50 = vpop.xlane.xlu1 %883 }
 0x3a0   : > { %v885_v51 = vsub.f32 %v876_v39, %v884_v50  ;;  %v1794_v50 = vld [vmem:[%s2109_s2 + $0x8] sm:$0xff]  }
 0x3a2   : > { %v886_v52 = vmul.f32 1.442695, %v885_v51  ;;  %v1795_v51 = vld [vmem:[%s2109_s2] sm:$0xff]   ;;  %s2357_s2 = sld [smem:[#allocation9_spill]] }
 0x3a4   : > { %1796 = vpow2.f32 %v886_v52  ;;  %v1593_v52 = vld [vmem:[%s665_s5] ss:$0 sm:$0xff]  ;;  %s2358_s5 = sld [smem:[#allocation7_spill]] }
 0x3a7   : > { %v996_v53 = vpop.xlane.xlu0 %995 }
 0x3a8   : > { %v997_v54 = vsub.f32 %v989_v45, %v996_v53  ;;  %s1606_s20 = sshll.u32 %s2357_s2, 7 }
 0x3a9   : > { %s1373_s23 = scalar_lea.hbm %s2360_s0, %s1606_s20 }
 0x3aa   : > { %v998_v55 = vmul.f32 1.442695, %v997_v54  ;;  %s2361_s25 = sand.u32 1, %s2358_s5  }
 0x3ab   : > { %s1362_s21 = scalar_lea.sflag [#allocation4], %s2361_s25 }
 0x3ac   : > { %1798 = vpow2.f32 %v998_v55 }
 0x3b1   : > { %v1797_v56 = vpop.eup %1796 }
 0x3b2   : > { %v888_v57 = vsel %vm881_vm8, %v1797_v56, 0.0 }
 0x3b3   : > { %889 = vadd.xlane.f32.xlu0 %v888_v57 }
 0x3b9   : > { %v1799_v58 = vpop.eup %1798 }
 0x3ba   : > { %v1000_v59 = vsel %vm881_vm8, %v1799_v58, 0.0 }
 0x3bb   : > { %1001 = vadd.xlane.f32.xlu1 %v1000_v59 }
 0x3c9   : > { %1007 = vrot.lane.b32.xlu0 %v831_v24, %s1907_s18  ;;  %v1585_v24 = vld [vmem:[%s2354_s28] ss:$0 sm:$0xff]  ;;  %s1375_s28 = sshll.u32 %s2123_s9, 4  ;;  %s1376_s28 = int_to_ptr.vmem [resolvable:$true] %s1375_s28 }
 0x43c   : > { %v890_v60 = vpop.xlane.xlu0 %889 }
 0x43d   : > { %1800 = vrcp.f32 %v890_v60 }
 0x440   : > { %v1008_v0 = vpop.permute.xlu0 %1007 }
 0x441   : > { %v1013_v2 = vsel %vm897_vm6, %v1008_v0, 0 }
 0x444   : > { %v1002_v61 = vpop.xlane.xlu1 %1001 }
 0x445   : > { %1802 = vrcp.f32 %v1002_v61 }
 0x44a   : > { %v1801_v62 = vpop.eup %1800 }
 0x44b   : > { %v892_v63 = vmul.f32 %v1801_v62, %v1797_v56 }
 0x44d   : > { %v893_v1 = vpack.c.bf16 %v892_v63, %v892_v63 }
 0x44f   : > { %1652 = vmatmul.mubr.msk.bf16.vlgmr.msra.gmra.mxu0 %vm881_vm8, %v893_v1 }
 0x450   : > { %1662 = vmatpush3.bf16.msra.mxu0 %v1013_v2  ;;  %1663 = vmatprep.mubr.msk.bf16.mxu0 %vm1906_vm5, %v1905_v20 }
 0x451   : > { %1679 = vmatprep.subr.bf16.mxu0 %v1905_v20 }
 0x452   : > { %v1803_v3 = vpop.eup %1802 }
 0x453   : > { %v1004_v4 = vmul.f32 %v1803_v3, %v1799_v58 }
 0x455   : > { %v1005_v5 = vpack.c.bf16 %v1004_v4, %v1004_v4 }
 0x457   : > { %1664 = vmatmul.mubr.msk.bf16.vlgmr.msra.gmra.mxu0 %vm881_vm8, %v1005_v5 }
 0x458   : > { %1683 = vmatprep.mubr.msk.bf16.mxu0 %vm1906_vm5, %v1905_v20  ;;  %1680 = vmatpush3.bf16.msra.mxu0 %v1790_v37 }
 0x459   : > { %1681 = vmatprep.subr.bf16.mxu0 %v1905_v20 }
 0x45c   : > { %1682 = vmatpush3.bf16.msra.mxu0 %v1791_v38 }
 0x45d   : > { %1687 = vmatprep.subr.bf16.mxu0 %v1905_v20 }
 0x50f   : > { %v935_v9 = vpop.f32.mrf.mxu0 }
 0x510   : > { %v941_v11 = vpack.c.bf16 %v935_v9, %v935_v9 }
 0x511   : > { %v1653_v12 = vpop.f32.mrf.mxu0 }
 0x512   : > { %943 = vst.msk [vmem:[#allocation2] sm:$0xf] %vm942_vm9, %v941_v11  ;;  %v1603_v12 = vld [vmem:[%s676_s29] ss:$0 sm:$0xff]  ;;  %s1808_s29 = scalar_lea.vmem %s1376_s28, 128 }
 0x513   : > { %v938_v13 = vpop.f32.mrf.mxu0  ;;  %p1809_p1 = scmp.ne.s32.totalorder %s1376_s28, %s1808_s29 }
 0x515   : > { %v1654_v14 = vpop.f32.mrf.mxu0  ;;  %p1810_p2 = pnand %p1809_p1, %p2041_p3 }
 0x516   : > { %v1604_v14 = vld [vmem:[%s679_s27] ss:$0 sm:$0xff]  ;;  %s1812_s27 = sshll.u32 %s1911_s16, 4  ;;  %s1813_s27 = int_to_ptr.vmem [resolvable:$false] %s1812_s27 }
 0x517   : > { %v1049_v15 = vpop.f32.mrf.mxu0  ;;  %p1811_p4 = pneg %p1810_p2  ;;  %s1814_s3 = scalar_lea.vmem %s1813_s27, 256 }
 0x518   : > { %v1613_v16 = vpack.c.bf16 %v1049_v15, %v1049_v15  ;;  %p1815_p5 = scmp.lt.s32.totalorder %s1376_s28, %s1813_s27  ;;  %p1816_p6 = scmp.lt.s32.totalorder %s1814_s3, %s1808_s29 }
 0x519   : > { %v1665_v17 = vpop.f32.mrf.mxu0 }
 0x51a   : > { %1059 = vrot.lane.b32.xlu1 %v1613_v16, %s1909_s4  ;;  %p1817_p7 = por %p1816_p6, %p1815_p5 }
 0x51b   : > { %v1052_v19 = vpop.f32.mrf.mxu0 }
 0x51c   : > { %p1818_p8 = pnand %p1817_p7, %p1811_p4 }
 0x51d   : > { %v1666_v21 = vpop.f32.mrf.mxu0 }
 0x58c   : > { %v1060_v22 = vpop.permute.xlu1 %1059 }
 0x58d   : > { %1063 = vst.msk [vmem:[#allocation2] sm:$0xf] %vm1062_vm10, %v1060_v22 }
 0x594   : > { %v1064_v23 = vld [vmem:[#allocation2] sm:$0xf] }
 0x595   : > { %1676 = vmatmul.mubr.msk.bf16.vlgmr.msra.gmra.mxu1 %vm1104_vm11, %v1064_v23 }
 0x655   : > { %v1142_v25 = vpop.f32.mrf.mxu1 }
 0x656   : > { %v1143_v26 = vadd.f32 %v1585_v24, %v1142_v25 }
 0x657   : > { %v1677_v27 = vpop.f32.mrf.mxu1 }
 0x658   : > { %v1148_v28 = vadd.f32 %v1143_v26, %v2141_v18 }
 0x659   : > { %v1145_v29 = vpop.f32.mrf.mxu1 }
 0x65a   : > { %v1151_v30 = vsel %vm785_vm4, %v1148_v28, 0.0 }
 0x65b   : > { %1152 = vadd.xlane.f32.xlu1 %v1151_v30  ;;  %v1678_v31 = vpop.f32.mrf.mxu1 }
 0x6e4   : > { %v1153_v32 = vpop.xlane.xlu1 %1152 }
 0x6e5   : > { %v1155_v33 = vmul.f32 0.03125, %v1153_v32 }
 0x6e7   : > { %v1156_v34 = vsub.f32 %v1148_v28, %v1155_v33 }
 0x6e9   : > { %v1157_v35 = vmul.f32 %v1156_v34, %v1156_v34 }
 0x6eb   : > { %v1158_v36 = vsel %vm785_vm4, %v1157_v35, 0.0 }
 0x6ec   : > { %1159 = vadd.xlane.f32.xlu0 %v1158_v36 }
 0x775   : > { %v1160_v18 = vpop.xlane.xlu0 %1159 }
 0x776   : > { %v1161_v39 = vmul.f32 0.03125, %v1160_v18 }
 0x778   : > { %v1162_v40 = vadd.f32 1e-05, %v1161_v39 }
 0x77a   : > { %1804 = vrsqrt.f32 %v1162_v40 }
 0x787   : > { %v1805_v41 = vpop.eup %1804 }
 0x788   : > { %v1164_v43 = vmul.f32 %v1805_v41, %v1156_v34 }
 0x78a   : > { %v1171_v45 = vmul.f32 %v1591_v42, %v1164_v43 }
 0x78c   : > { %v1178_v46 = vadd.f32 %v1592_v44, %v1171_v45 }
 0x78e   : > { %v1183_v48 = vpack.c.bf16 %v1178_v46, %v1178_v46 }
 0x790   : > { %1684 = vmatmul.mubr.msk.bf16.vlgmr.msra.gmra.mxu0 %vm785_vm4, %v1183_v48 }
 0x791   : > { %1688 = vmatpush3.bf16.msra.mxu0 %v1792_v47  ;;  %1695 = vmatprep.mubr.msk.bf16.mxu0 %vm1906_vm5, %v1905_v20 }
 0x792   : > { %1689 = vmatprep.subr.bf16.mxu0 %v1905_v20 }
 0x795   : > { %1690 = vmatpush3.bf16.msra.mxu0 %v1793_v49 }
 0x796   : > { %1691 = vmatprep.subr.bf16.mxu0 %v1905_v20 }
 0x799   : > { %1692 = vmatpush3.bf16.msra.mxu0 %v1794_v50 }
 0x79a   : > { %1693 = vmatprep.subr.bf16.mxu0 %v1905_v20  ;;  %v1597_v20 = vld [vmem:[%s673_s17] ss:$0 sm:$0xff] }
 0x79d   : > { %1694 = vmatpush3.bf16.msra.mxu0 %v1795_v51 }
 0x850   : > { %v1240_v53 = vpop.f32.mrf.mxu0 }
 0x851   : > { %v1241_v54 = vadd.f32 %v1593_v52, %v1240_v53 }
 0x852   : > { %v1685_v55 = vpop.f32.mrf.mxu0 }
 0x853   : > { %v1246_v56 = vmax.f32 %v1241_v54, 0.0 }
 0x854   : > { %v1243_v57 = vpop.f32.mrf.mxu0 }
 0x855   : > { %v1255_v58 = vpack.c.bf16 %v1246_v56, %v1246_v56 }
 0x856   : > { %v1686_v59 = vpop.f32.mrf.mxu0 }
 0x857   : > { %1696 = vmatmul.mubr.msk.bf16.vlgmr.msra.gmra.mxu0 %vm1104_vm11, %v1255_v58 }
 0x917   : > { %v1324_v60 = vpop.f32.mrf.mxu0 }
 0x918   : > { %v1325_v61 = vadd.f32 %v1597_v20, %v1324_v60 }
 0x919   : > { %v1697_v62 = vpop.f32.mrf.mxu0 }
 0x91a   : > { %v1330_v63 = vadd.f32 %v1325_v61, %v1178_v46 }
 0x91b   : > { %v1327_v0 = vpop.f32.mrf.mxu0 }
 0x91c   : > { %v1333_v1 = vsel %vm785_vm4, %v1330_v63, 0.0 }
 0x91d   : > { %1334 = vadd.xlane.f32.xlu0 %v1333_v1  ;;  %v1698_v2 = vpop.f32.mrf.mxu0 }
 0x9a6   : > { %v1335_v3 = vpop.xlane.xlu0 %1334 }
 0x9a7   : > { %v1336_v4 = vmul.f32 0.03125, %v1335_v3 }
 0x9a9   : > { %v1337_v5 = vsub.f32 %v1330_v63, %v1336_v4 }
 0x9ab   : > { %v1338_v6 = vmul.f32 %v1337_v5, %v1337_v5 }
 0x9ad   : > { %v1339_v7 = vsel %vm785_vm4, %v1338_v6, 0.0 }
 0x9ae   : > { %1340 = vadd.xlane.f32.xlu1 %v1339_v7 }
 0xa37   : > { %v1341_v8 = vpop.xlane.xlu1 %1340 }
 0xa38   : > { %v1342_v9 = vmul.f32 0.03125, %v1341_v8 }
 0xa3a   : > { %v1343_v10 = vadd.f32 1e-05, %v1342_v9 }
 0xa3c   : > { %1806 = vrsqrt.f32 %v1343_v10 }
 0xa49   : > { %v1807_v11 = vpop.eup %1806 }
 0xa4a   : > { %v1345_v13 = vmul.f32 %v1807_v11, %v1337_v5 }
 0xa4c   : > { %v1352_v15 = vmul.f32 %v1603_v12, %v1345_v13 }
 0xa4e   : > { %v1359_v16 = vadd.f32 %v1604_v14, %v1352_v15 }
 0xa50   : > { %1360 = vst.msk [vmem:[%s2123_s9] sm:$0xff] %vm785_vm4, %v1359_v16 }
 0xa51   : > { %1821 = shalt.err (!%p1818_p8)
}
 0xa52   : > { %s1822_s22 = scalar_lea.hbm %s1373_s23, 128  ;;  %s1826_s24 = scalar_lea.hbm %s2360_s0, 256 }
 0xa53   : > { %p1823_p10 = scmp.ne.s32.totalorder %s1373_s23, %s1822_s22  ;;  %p1827_p13 = scmp.lt.s32.totalorder %s1373_s23, %s2360_s0 }
 0xa54   : > { %p1828_p0 = scmp.lt.s32.totalorder %s1826_s24, %s1822_s22 }
 0xa55   : > { %p1824_p11 = pnand %p1823_p10, %p2041_p3 }
 0xa56   : > { %p1829_p1 = por %p1828_p0, %p1827_p13 }
 0xa57   : > { %p1825_p12 = pneg %p1824_p11 }
 0xa59   : > { %p1830_p2 = pnand %p1829_p1, %p1825_p12 }
 0xa5b   : > { %1833 = shalt.err (!%p1830_p2)
}
 0xa5c   : > { %1699 = dma.vmem_to_hbm [thread:$0]  (%p2041_p3), %s1376_s28, 128, %s1373_s23, %s1362_s21  }
 0xa5d PF: > { %s2362_s18 = sld [smem:[#allocation12_spill]] }
 0xa5e   : > { %s2363_s26 = sld [smem:[#allocation6_spill]] }
 0xa63   : > { %p1705_p4 = scmp.ge.s32.totalorder %s2362_s18, 2 }
 0xa64   : > { %s1387_s19 = sand.u32 1, %s2363_s26  }
 0xa65   : > { %p1702_p5 = pnand %p1705_p4, %p2051_p9  ;;  %s1388_s20 = scalar_lea.sflag [#allocation4], %s1387_s19 }
 0xa67   : > { %p1703_p6 = pneg %p1702_p5 }
 0xa69   : > { %1867 = dma.done.wait (%p1703_p6), %s1388_s20, 128  }
 0xa6a   : > { %1869 = vsyncadd (%p1703_p6), %s1388_s20, 4294967168  ;;  %s28_s25 = sadd.s32 1, %s2362_s18   ;;  %s2365_s18 = sld [smem:[#allocation7_spill]] }
 0xa6b   : > { %p25_p7 = scmp.ge.s32.totalorder %s28_s25, 6   ;;  %s2366_s19 = sld [smem:[#allocation8_spill]] }
 0xa6c   : > { %s2367_s20 = sld [smem:[#allocation17_spill]] }
 0xa6d   : > { %s2368_s21 = sld [smem:[#allocation10_spill]]  ;;  %27 = sbr.rel (!%p25_p7) target bundleno = 14 (0xe), region = 152 }
 0xa6e   : > { %s2369_s22 = sld [smem:[#allocation11_spill]] }
 0xa6f   : > { %s2370_s23 = sld [smem:[#allocation13_spill]] }
 0xa70   : > { %s2371_s24 = sld [smem:[#allocation15_spill]] }
 0xa72   :  { %1393 = vsyncpa [#allocation4], 1 }
 0xa73   :  { %1395 = vsyncpa [#allocation4 + $0x1], 1 }

</bundles_post_ra>
